<compile_context>
chip_gen: v6e
topology: v6e:2x2x1
jax: 0.10.0
libtpu: 0.0.40
codegen_flags: <defaults>
</compile_context>

<pallas_src>
import functools
from math import sqrt

import numpy as np
import jax
import jax.numpy as jnp
from jax.experimental import pallas as pl
from jax.experimental.pallas import tpu as pltpu

_LANE = 128
_BF16_SUBLANE = 16            # native bf16 layout tile is (16, 128)
_MAX_TILE_BATCH = 1024


def _round_up(x, m):
    return ((x + m - 1) // m) * m


def _nbytes(shape, dtype):
    return int(np.prod(shape)) * jnp.dtype(dtype).itemsize


def actor_kernel(x_ref, w1_ref, b1_ref, w2_ref, b2_ref, w3_ref, b3_ref,
                 w4_ref, b4_ref, o_ref, *, max_action):
    # Hidden layers: bf16 matmuls on the MXU with f32 accumulation, f32 epilogue.
    h = jnp.dot(x_ref[...], w1_ref[...], preferred_element_type=jnp.float32)
    h = jnp.maximum(h + b1_ref[...], 0.0).astype(jnp.bfloat16)
    h = jnp.dot(h, w2_ref[...], preferred_element_type=jnp.float32)
    h = jnp.maximum(h + b2_ref[...], 0.0).astype(jnp.bfloat16)
    h = jnp.dot(h, w3_ref[...], preferred_element_type=jnp.float32)
    h = jnp.maximum(h + b3_ref[...], 0.0).astype(jnp.bfloat16)
    # Output layer + tanh (+ compile-time-folded max_action scale).
    out = jnp.dot(h, w4_ref[...], preferred_element_type=jnp.float32) + b4_ref[...]
    out = jnp.tanh(out)
    if max_action != 1.0:  # Python-level branch -> folded at trace time.
        out = max_action * out
    o_ref[...] = out.astype(o_ref.dtype)


def prepare_params(params):
    """Pad weight N-dims to multiples of 128 and cast (weights -> bf16, biases -> f32).

    Do this ONCE per parameter set and reuse the result across forward calls;
    re-padding every call can cost more than the kernel itself for a small actor.
    The state/K dim of w1 is intentionally left unpadded.
    """
    if isinstance(params, dict) and params.get("_prepared", False):
        return params

    w1, b1 = params["w1"], params["b1"]
    w2, b2 = params["w2"], params["b2"]
    w3, b3 = params["w3"], params["b3"]
    w4, b4 = params["w4"], params["b4"]

    S, H1 = w1.shape
    H2, H3, A = w2.shape[1], w3.shape[1], w4.shape[1]
    H1p, H2p, H3p, Ap = (_round_up(d, _LANE) for d in (H1, H2, H3, A))

    def padw(w, rows, cols):
        w = w.astype(jnp.float32)
        w = jnp.pad(w, ((0, rows - w.shape[0]), (0, cols - w.shape[1])))
        return w.astype(jnp.bfloat16)

    def padb(b, cols):
        b = jnp.asarray(b).reshape(1, -1).astype(jnp.float32)
        return jnp.pad(b, ((0, 0), (0, cols - b.shape[1])))

    return {
        "w1": padw(w1, S, H1p),   "b1": padb(b1, H1p),
        "w2": padw(w2, H1p, H2p), "b2": padb(b2, H2p),
        "w3": padw(w3, H2p, H3p), "b3": padb(b3, H3p),
        "w4": padw(w4, H3p, Ap),  "b4": padb(b4, Ap),
        "action_dim": A,
        "_prepared": True,
    }


def deterministic_actor_forward(state, params, *, max_action=1.0, tile_batch=None):
    """Fused forward pass of DeterministicActor.

    state:  (B, state_dim) float32
    params: raw param dict (w1..w4 (in,out), b1..b4 (1,out)) or the output of
            prepare_params() (preferred in hot loops).
    """
    if not (isinstance(params, dict) and params.get("_prepared", False)):
        params = prepare_params(params)

    w1, b1 = params["w1"], params["b1"]
    w2, b2 = params["w2"], params["b2"]
    w3, b3 = params["w3"], params["b3"]
    w4, b4 = params["w4"], params["b4"]
    A = params["action_dim"]

    B, S = state.shape
    assert w1.shape[0] == S, "state_dim mismatch with prepared params"
    H1p, H2p, H3p, Ap = w1.shape[1], w2.shape[1], w3.shape[1], w4.shape[1]
    Hmax = max(H1p, H2p, H3p, Ap)

    bf16, f32 = jnp.bfloat16, jnp.float32

    # bf16 output in the large-batch (mem-bound) regime halves HBM writeback of
    # the lane-padded action tile; small batches keep f32.
    out_dtype = bf16 if B >= 256 else f32
    out_itemsize = jnp.dtype(out_dtype).itemsize

    # VMEM footprint terms.
    #   Weights/biases: single-buffered (grid-invariant) -> counted once.
    weight_bytes = sum(_nbytes(a.shape, a.dtype)
                       for a in (w1, b1, w2, b2, w3, b3, w4, b4))
    #   Per batch-row: double-buffered x tile + double-buffered out tile +
    #   in-kernel transient activations (f32 h + bf16 copy + MXU result ~ 4x Hmax f32).
    per_row = 2 * S * 2 + 2 * Ap * out_itemsize + 4 * Hmax * 4

    try:
        vmem_cap = int(pltpu.get_tpu_info().vmem_capacity_bytes)
    except Exception:
        vmem_cap = 64 * 1024 * 1024  # v7x floor; v5e/v6e have 128 MiB

    if tile_batch is None:
        b16 = _round_up(B, _BF16_SUBLANE)
        if b16 <= _MAX_TILE_BATCH:
            # Single tile: at these sizes the kernel is HBM/weight-bound, so
            # splitting the batch across TensorCores only duplicates weight DMA.
            tile_batch = b16
        else:
            # Budget-derived tile for very large batches.
            budget = min(48 * 1024 * 1024, vmem_cap // 2) - weight_bytes
            tile_batch = max(budget // per_row, _BF16_SUBLANE)
            tile_batch = min(_MAX_TILE_BATCH,
                             (tile_batch // _BF16_SUBLANE) * _BF16_SUBLANE)
    tile_batch = _round_up(int(tile_batch), _BF16_SUBLANE)
    Bp = _round_up(B, tile_batch)

    # State: cast to bf16, pad only the batch dim. The feature (K) dim stays at
    # its true size S -- the block's last dim equals the full array dim.
    xp = state.astype(bf16)
    if Bp != B:
        xp = jnp.pad(xp, ((0, Bp - B), (0, 0)))

    grid = (Bp // tile_batch,)

    def resident_spec(arr):
        # Grid-invariant parameter: fetched once, single VMEM buffer, stays resident.
        return pl.BlockSpec(arr.shape, lambda i: (0, 0),
                            pipeline_mode=pl.Buffered(1))

    est = weight_bytes + tile_batch * per_row
    vmem_limit = None
    if est > 14 * 1024 * 1024:
        vmem_limit = int(min(56 * 1024 * 1024,
                             vmem_cap * 3 // 4,
                             max(est + est // 4, 20 * 1024 * 1024)))

    kernel = functools.partial(actor_kernel, max_action=float(max_action))

    out_padded = pl.pallas_call(
        kernel,
        out_shape=jax.ShapeDtypeStruct((Bp, Ap), out_dtype),
        grid_spec=pltpu.PrefetchScalarGridSpec(
            num_scalar_prefetch=0,
            grid=grid,
            in_specs=[
                pl.BlockSpec((tile_batch, S), lambda i: (i, 0)),
                resident_spec(w1), resident_spec(b1),
                resident_spec(w2), resident_spec(b2),
                resident_spec(w3), resident_spec(b3),
                resident_spec(w4), resident_spec(b4),
            ],
            out_specs=pl.BlockSpec((tile_batch, Ap), lambda i: (i, 0)),
        ),
        compiler_params=pltpu.CompilerParams(
            dimension_semantics=("parallel",),
            vmem_limit_bytes=vmem_limit),
    )(xp, w1, b1, w2, b2, w3, b3, w4, b4)

    # Drop batch / action-lane padding; return in caller dtype.
    return out_padded[:B, :A].astype(state.dtype)


def init_params(key, state_dim, hidden_dim, action_dim, edac_init=False):
    """PyTorch-style Linear init: U(-1/sqrt(fan_in), 1/sqrt(fan_in)); weights stored (in, out)."""
    dims = [(state_dim, hidden_dim), (hidden_dim, hidden_dim),
            (hidden_dim, hidden_dim), (hidden_dim, action_dim)]
    params = {}
    for idx, (fan_in, fan_out) in enumerate(dims, start=1):
        key, kw, kb = jax.random.split(key, 3)
        bound = 1.0 / sqrt(fan_in)
        params[f"w{idx}"] = jax.random.uniform(
            kw, (fan_in, fan_out), jnp.float32, minval=-bound, maxval=bound)
        if edac_init and idx <= 3:
            params[f"b{idx}"] = jnp.full((1, fan_out), 0.1, jnp.float32)
        else:
            params[f"b{idx}"] = jax.random.uniform(
                kb, (1, fan_out), jnp.float32, minval=-bound, maxval=bound)
    return params


def reference_forward(state, params, max_action=1.0):
    h = jnp.maximum(state @ params["w1"] + params["b1"], 0.0)
    h = jnp.maximum(h @ params["w2"] + params["b2"], 0.0)
    h = jnp.maximum(h @ params["w3"] + params["b3"], 0.0)
    return max_action * jnp.tanh(h @ params["w4"] + params["b4"])


if __name__ == "__main__":
    key = jax.random.PRNGKey(0)
    # Small, deliberately unaligned shapes to exercise padding / unpadded-K paths.
    batch, state_dim, hidden_dim, action_dim = 10, 17, 32, 4
    max_action = 2.0

    key, k_state = jax.random.split(key)
    state = jax.random.normal(k_state, (batch, state_dim), jnp.float32)
    raw_params = init_params(key, state_dim, hidden_dim, action_dim, edac_init=False)

    # Pad/cast parameters once (cache this in an RL loop).
    params = prepare_params(raw_params)

    out = deterministic_actor_forward(state, params, max_action=max_action)
    out = jax.block_until_ready(out)

    ref = jax.block_until_ready(reference_forward(state, raw_params, max_action))
    assert out.shape == (batch, action_dim)
    # bf16 matmul inputs with f32 accumulation -> small drift vs. the f32 reference.
    assert jnp.max(jnp.abs(out - ref)) < 1e-1, float(jnp.max(jnp.abs(out - ref)))

    print("KERNEL_OK")
</pallas_src>

<mosaic_0001>
module attributes {stable_mosaic.version = 11 : i64} {
  func.func @actor_kernel(%arg0: i32, %arg1: memref<16x17xbf16, #tpu.memory_space<vmem>>, %arg2: memref<17x128xbf16, #tpu.memory_space<vmem>>, %arg3: memref<1x128xf32, #tpu.memory_space<vmem>>, %arg4: memref<128x128xbf16, #tpu.memory_space<vmem>>, %arg5: memref<1x128xf32, #tpu.memory_space<vmem>>, %arg6: memref<128x128xbf16, #tpu.memory_space<vmem>>, %arg7: memref<1x128xf32, #tpu.memory_space<vmem>>, %arg8: memref<128x128xbf16, #tpu.memory_space<vmem>>, %arg9: memref<1x128xf32, #tpu.memory_space<vmem>>, %arg10: memref<16x128xf32, #tpu.memory_space<vmem>>) attributes {dimension_semantics = [#tpu.dimension_semantics<parallel>], iteration_bounds = array<i64: 1>, scalar_prefetch = 0 : i64, scratch_operands = 0 : i64, tpu.core_type = #tpu.core_type<tc>, window_params = [{transform_indices = @transform_0, window_bounds = array<i64: 16, 17>}, {pipeline_mode = #tpu.pipeline_mode<synchronous>, transform_indices = @transform_1, window_bounds = array<i64: 17, 128>}, {pipeline_mode = #tpu.pipeline_mode<synchronous>, transform_indices = @transform_2, window_bounds = array<i64: 1, 128>}, {pipeline_mode = #tpu.pipeline_mode<synchronous>, transform_indices = @transform_3, window_bounds = array<i64: 128, 128>}, {pipeline_mode = #tpu.pipeline_mode<synchronous>, transform_indices = @transform_4, window_bounds = array<i64: 1, 128>}, {pipeline_mode = #tpu.pipeline_mode<synchronous>, transform_indices = @transform_5, window_bounds = array<i64: 128, 128>}, {pipeline_mode = #tpu.pipeline_mode<synchronous>, transform_indices = @transform_6, window_bounds = array<i64: 1, 128>}, {pipeline_mode = #tpu.pipeline_mode<synchronous>, transform_indices = @transform_7, window_bounds = array<i64: 128, 128>}, {pipeline_mode = #tpu.pipeline_mode<synchronous>, transform_indices = @transform_8, window_bounds = array<i64: 1, 128>}, {transform_indices = @transform_9, window_bounds = array<i64: 16, 128>}]} {
    %c0 = arith.constant 0 : index
    %c0_0 = arith.constant 0 : index
    %0 = vector.load %arg1[%c0, %c0_0] : memref<16x17xbf16, #tpu.memory_space<vmem>>, vector<16x17xbf16>
    %c0_1 = arith.constant 0 : index
    %c0_2 = arith.constant 0 : index
    %1 = vector.load %arg2[%c0_1, %c0_2] : memref<17x128xbf16, #tpu.memory_space<vmem>>, vector<17x128xbf16>
    %cst = arith.constant dense<0.000000e+00> : vector<16x128xf32>
    %2 = tpu.matmul %0, %1, %cst {dimension_numbers = #tpu.dot_dimension_numbers<[1], [0], [0], [1], [0, 0, 1, 1], [], []>} : vector<16x17xbf16>, vector<17x128xbf16>, vector<16x128xf32> -> vector<16x128xf32>
    %c0_3 = arith.constant 0 : index
    %c0_4 = arith.constant 0 : index
    %3 = vector.load %arg3[%c0_3, %c0_4] : memref<1x128xf32, #tpu.memory_space<vmem>>, vector<1x128xf32>
    %4 = vector.broadcast %3 : vector<1x128xf32> to vector<16x128xf32>
    %5 = arith.addf %2, %4 : vector<16x128xf32>
    %cst_5 = arith.constant 0.000000e+00 : f32
    %6 = vector.broadcast %cst_5 : f32 to vector<16x128xf32>
    %7 = arith.maximumf %5, %6 : vector<16x128xf32>
    %8 = arith.truncf %7 : vector<16x128xf32> to vector<16x128xbf16>
    %c0_6 = arith.constant 0 : index
    %c0_7 = arith.constant 0 : index
    %9 = vector.load %arg4[%c0_6, %c0_7] : memref<128x128xbf16, #tpu.memory_space<vmem>>, vector<128x128xbf16>
    %cst_8 = arith.constant dense<0.000000e+00> : vector<16x128xf32>
    %10 = tpu.matmul %8, %9, %cst_8 {dimension_numbers = #tpu.dot_dimension_numbers<[1], [0], [0], [1], [0, 0, 1, 1], [], []>} : vector<16x128xbf16>, vector<128x128xbf16>, vector<16x128xf32> -> vector<16x128xf32>
    %c0_9 = arith.constant 0 : index
    %c0_10 = arith.constant 0 : index
    %11 = vector.load %arg5[%c0_9, %c0_10] : memref<1x128xf32, #tpu.memory_space<vmem>>, vector<1x128xf32>
    %12 = vector.broadcast %11 : vector<1x128xf32> to vector<16x128xf32>
    %13 = arith.addf %10, %12 : vector<16x128xf32>
    %cst_11 = arith.constant 0.000000e+00 : f32
    %14 = vector.broadcast %cst_11 : f32 to vector<16x128xf32>
    %15 = arith.maximumf %13, %14 : vector<16x128xf32>
    %16 = arith.truncf %15 : vector<16x128xf32> to vector<16x128xbf16>
    %c0_12 = arith.constant 0 : index
    %c0_13 = arith.constant 0 : index
    %17 = vector.load %arg6[%c0_12, %c0_13] : memref<128x128xbf16, #tpu.memory_space<vmem>>, vector<128x128xbf16>
    %cst_14 = arith.constant dense<0.000000e+00> : vector<16x128xf32>
    %18 = tpu.matmul %16, %17, %cst_14 {dimension_numbers = #tpu.dot_dimension_numbers<[1], [0], [0], [1], [0, 0, 1, 1], [], []>} : vector<16x128xbf16>, vector<128x128xbf16>, vector<16x128xf32> -> vector<16x128xf32>
    %c0_15 = arith.constant 0 : index
    %c0_16 = arith.constant 0 : index
    %19 = vector.load %arg7[%c0_15, %c0_16] : memref<1x128xf32, #tpu.memory_space<vmem>>, vector<1x128xf32>
    %20 = vector.broadcast %19 : vector<1x128xf32> to vector<16x128xf32>
    %21 = arith.addf %18, %20 : vector<16x128xf32>
    %cst_17 = arith.constant 0.000000e+00 : f32
    %22 = vector.broadcast %cst_17 : f32 to vector<16x128xf32>
    %23 = arith.maximumf %21, %22 : vector<16x128xf32>
    %24 = arith.truncf %23 : vector<16x128xf32> to vector<16x128xbf16>
    %c0_18 = arith.constant 0 : index
    %c0_19 = arith.constant 0 : index
    %25 = vector.load %arg8[%c0_18, %c0_19] : memref<128x128xbf16, #tpu.memory_space<vmem>>, vector<128x128xbf16>
    %cst_20 = arith.constant dense<0.000000e+00> : vector<16x128xf32>
    %26 = tpu.matmul %24, %25, %cst_20 {dimension_numbers = #tpu.dot_dimension_numbers<[1], [0], [0], [1], [0, 0, 1, 1], [], []>} : vector<16x128xbf16>, vector<128x128xbf16>, vector<16x128xf32> -> vector<16x128xf32>
    %c0_21 = arith.constant 0 : index
    %c0_22 = arith.constant 0 : index
    %27 = vector.load %arg9[%c0_21, %c0_22] : memref<1x128xf32, #tpu.memory_space<vmem>>, vector<1x128xf32>
    %28 = vector.broadcast %27 : vector<1x128xf32> to vector<16x128xf32>
    %29 = arith.addf %26, %28 : vector<16x128xf32>
    %30 = math.tanh %29 : vector<16x128xf32>
    %cst_23 = arith.constant 2.000000e+00 : f32
    %31 = vector.broadcast %cst_23 : f32 to vector<16x128xf32>
    %32 = arith.mulf %31, %30 : vector<16x128xf32>
    %c0_24 = arith.constant 0 : index
    %c0_25 = arith.constant 0 : index
    %33 = vector.load %arg10[%c0_24, %c0_25] : memref<16x128xf32, #tpu.memory_space<vmem>>, vector<16x128xf32>
    tpu.vector_store %arg10[%c0_24, %c0_25], %32 {strides = array<i32>} : memref<16x128xf32, #tpu.memory_space<vmem>>, vector<16x128xf32>,
    return
  }
  func.func @transform_0(%arg0: i32) -> (i32, i32) {
    %c0_i32 = arith.constant 0 : i32
    %c0_i32_0 = arith.constant 0 : i32
    return %arg0, %c0_i32 : i32, i32
  }
  func.func @transform_1(%arg0: i32) -> (i32, i32) {
    %c0_i32 = arith.constant 0 : i32
    %c0_i32_0 = arith.constant 0 : i32
    %c0_i32_1 = arith.constant 0 : i32
    return %c0_i32, %c0_i32_0 : i32, i32
  }
  func.func @transform_2(%arg0: i32) -> (i32, i32) {
    %c0_i32 = arith.constant 0 : i32
    %c0_i32_0 = arith.constant 0 : i32
    %c0_i32_1 = arith.constant 0 : i32
    return %c0_i32, %c0_i32_0 : i32, i32
  }
  func.func @transform_3(%arg0: i32) -> (i32, i32) {
    %c0_i32 = arith.constant 0 : i32
    %c0_i32_0 = arith.constant 0 : i32
    %c0_i32_1 = arith.constant 0 : i32
    return %c0_i32, %c0_i32_0 : i32, i32
  }
  func.func @transform_4(%arg0: i32) -> (i32, i32) {
    %c0_i32 = arith.constant 0 : i32
    %c0_i32_0 = arith.constant 0 : i32
    %c0_i32_1 = arith.constant 0 : i32
    return %c0_i32, %c0_i32_0 : i32, i32
  }
  func.func @transform_5(%arg0: i32) -> (i32, i32) {
    %c0_i32 = arith.constant 0 : i32
    %c0_i32_0 = arith.constant 0 : i32
    %c0_i32_1 = arith.constant 0 : i32
    return %c0_i32, %c0_i32_0 : i32, i32
  }
  func.func @transform_6(%arg0: i32) -> (i32, i32) {
    %c0_i32 = arith.constant 0 : i32
    %c0_i32_0 = arith.constant 0 : i32
    %c0_i32_1 = arith.constant 0 : i32
    return %c0_i32, %c0_i32_0 : i32, i32
  }
  func.func @transform_7(%arg0: i32) -> (i32, i32) {
    %c0_i32 = arith.constant 0 : i32
    %c0_i32_0 = arith.constant 0 : i32
    %c0_i32_1 = arith.constant 0 : i32
    return %c0_i32, %c0_i32_0 : i32, i32
  }
  func.func @transform_8(%arg0: i32) -> (i32, i32) {
    %c0_i32 = arith.constant 0 : i32
    %c0_i32_0 = arith.constant 0 : i32
    %c0_i32_1 = arith.constant 0 : i32
    return %c0_i32, %c0_i32_0 : i32, i32
  }
  func.func @transform_9(%arg0: i32) -> (i32, i32) {
    %c0_i32 = arith.constant 0 : i32
    %c0_i32_0 = arith.constant 0 : i32
    return %arg0, %c0_i32 : i32, i32
  }
}

</mosaic_0001>

<bundles_post_ra>
// kernel: tpu_custom_call.1
= control target key start
LH: loop header
LB: loop body
LE: loop exit
PB: predicated region body
PF: predicated region fallthrough
CT: control target
= control target key end

     0   :  { %14 = vsyncpa [#allocation3], 0  ;;  %s993_s0 = inlined_call_operand.hbm [shape: bf16[16,17], index: 0, kind: input, shape index: {}]   ;;  %s994_s1 = inlined_call_operand.hbm [shape: bf16[17,128], index: 1, kind: input, shape index: {}]   ;;  %s995_s2 = inlined_call_operand.vmem [shape: f32[1,128], index: 2, kind: input, shape index: {}]   ;;  %s996_s3 = inlined_call_operand.hbm [shape: bf16[128,128], index: 3, kind: input, shape index: {}]   ;;  %s997_s4 = inlined_call_operand.vmem [shape: f32[1,128], index: 4, kind: input, shape index: {}]   ;;  %s998_s5 = inlined_call_operand.hbm [shape: bf16[128,128], index: 5, kind: input, shape index: {}]   ;;  %s999_s6 = inlined_call_operand.vmem [shape: f32[1,128], index: 6, kind: input, shape index: {}]   ;;  %s1000_s7 = inlined_call_operand.hbm [shape: bf16[128,128], index: 7, kind: input, shape index: {}]   ;;  %s1001_s8 = inlined_call_operand.vmem [shape: f32[1,128], index: 8, kind: input, shape index: {}]   ;;  %s1002_s9 = inlined_call_operand.hbm [shape: f32[16,128], index: 9, kind: output, shape index: {}]  }
   0x1   :  { %15 = vsyncpa [#allocation6], 0 }
   0x2   :  { %16 = vsyncpa [#allocation9], 0 }
   0x3   :  { %17 = vsyncpa [#allocation4], 0  ;;  %s851_s30 = smov [#allocation5]   ;;  %s852_s11 = smov [#allocation8]  }
   0x4   :  { %s35_s10 = sshll.u32 %s851_s30, 4  ;;  %s63_s12 = sshll.u32 %s852_s11, 4  ;;  %s36_s10 = int_to_ptr.vmem [resolvable:$true] %s35_s10  ;;  %s64_s12 = int_to_ptr.vmem [resolvable:$true] %s63_s12 }
   0x5   :  { %s731_s13 = scalar_lea.vmem %s36_s10, 192  ;;  %p736_p1 = scmp.lt.s32.totalorder %s36_s10, %s36_s10 }
   0x6   :  { %p732_p0 = scmp.ne.s32.totalorder %s36_s10, %s731_s13  ;;  %p737_p2 = scmp.lt.s32.totalorder %s731_s13, %s731_s13 }
   0x8   :  { %p738_p3 = por %p737_p2, %p736_p1 }
   0xa   :  { %p739_p4 = pnand %p738_p3, %p732_p0 }
   0xc   :  { %742 = shalt.err (!%p739_p4)
}
   0xd   :  { %s853_s14 = smov 64   ;;  %s854_s15 = smov 4  }
   0xe   :  { %41 = dma.hbm_to_vmem [thread:$0]  %s994_s1, 192, %s36_s10, [#allocation6], %s853_s14, %s853_s14, %s854_s15  }
   0xf   :  { %s751_s18 = scalar_lea.vmem %s64_s12, 1024  ;;  %p756_p6 = scmp.lt.s32.totalorder %s64_s12, %s64_s12 }
  0x10   :  { %p752_p5 = scmp.ne.s32.totalorder %s64_s12, %s751_s18  ;;  %p757_p7 = scmp.lt.s32.totalorder %s751_s18, %s751_s18 }
  0x12   :  { %p758_p8 = por %p757_p7, %p756_p6 }
  0x14   :  { %p759_p9 = pnand %p758_p8, %p752_p5 }
  0x16   :  { %762 = shalt.err (!%p759_p9)
}
  0x17   :  { %69 = dma.hbm_to_vmem [thread:$0]  %s998_s5, 1024, %s64_s12, [#allocation9], %s853_s14, %s853_s14, %s854_s15  }
  0x18   :  { %s855_s21 = smov [#allocation2]   ;;  %s856_s23 = smov [#allocation7]  }
  0x19   :  { %s23_s22 = sshll.u32 %s855_s21, 4  ;;  %s49_s24 = sshll.u32 %s856_s23, 4  ;;  %s24_s22 = int_to_ptr.vmem [resolvable:$true] %s23_s22  ;;  %s50_s24 = int_to_ptr.vmem [resolvable:$true] %s49_s24 }
  0x1a   :  { %s771_s1 = scalar_lea.vmem %s24_s22, 128  ;;  %p776_p11 = scmp.lt.s32.totalorder %s24_s22, %s24_s22 }
  0x1b   :  { %p772_p10 = scmp.ne.s32.totalorder %s24_s22, %s771_s1  ;;  %p777_p12 = scmp.lt.s32.totalorder %s771_s1, %s771_s1 }
  0x1d   :  { %p778_p13 = por %p777_p12, %p776_p11 }
  0x1f   :  { %p779_p0 = pnand %p778_p13, %p772_p10 }
  0x21   :  { %782 = shalt.err (!%p779_p0)
}
  0x22   :  { %29 = dma.hbm_to_vmem [thread:$0]  %s993_s0, 128, %s24_s22, [#allocation3], %s853_s14, %s853_s14, %s854_s15  }
  0x23   :  { %s791_s5 = scalar_lea.vmem %s50_s24, 1024  ;;  %p796_p2 = scmp.lt.s32.totalorder %s50_s24, %s50_s24 }
  0x24   :  { %p792_p1 = scmp.ne.s32.totalorder %s50_s24, %s791_s5  ;;  %p797_p3 = scmp.lt.s32.totalorder %s791_s5, %s791_s5 }
  0x26   :  { %p798_p4 = por %p797_p3, %p796_p2 }
  0x28   :  { %p799_p5 = pnand %p798_p4, %p792_p1 }
  0x2a   :  { %802 = shalt.err (!%p799_p5)
}
  0x2b   :  { %55 = dma.hbm_to_vmem [thread:$0]  %s996_s3, 1024, %s50_s24, [#allocation6], %s853_s14, %s853_s14, %s854_s15  }
  0x2c   :  { %s857_s29 = smov [#allocation10]  }
  0x2d   :  { %s77_s30 = sshll.u32 %s857_s29, 4  ;;  %s78_s30 = int_to_ptr.vmem [resolvable:$true] %s77_s30 }
  0x2e   :  { %s811_s10 = scalar_lea.vmem %s78_s30, 1024  ;;  %p816_p7 = scmp.lt.s32.totalorder %s78_s30, %s78_s30 }
  0x2f   :  { %p812_p6 = scmp.ne.s32.totalorder %s78_s30, %s811_s10  ;;  %p817_p8 = scmp.lt.s32.totalorder %s811_s10, %s811_s10 }
  0x31   :  { %p818_p9 = por %p817_p8, %p816_p7 }
  0x33   :  { %p819_p10 = pnand %p818_p9, %p812_p6 }
  0x35   :  { %822 = shalt.err (!%p819_p10)
}
  0x36   :  { %83 = dma.hbm_to_vmem [thread:$0]  %s1000_s7, 1024, %s78_s30, [#allocation9], %s853_s14, %s853_s14, %s854_s15  }
  0x37   :  { %843 = dma.done.wait [#allocation3], 128  }
  0x38   :  { %844 = vsyncadd [#allocation3], 4294967168 }
  0x39   :  { %845 = dma.done.wait [#allocation6], 1216  }
  0x3a   :  { %846 = vsyncadd [#allocation6], 4294966080 }
  0x3b   :  { %847 = dma.done.wait [#allocation9], 2048  }
  0x3c   :  { %848 = vsyncadd [#allocation9], 4294965248  ;;  %v858_v0 = vmov 0.0   ;;  %vm859_vm0 = vmmov 0   ;;  %vm132_vm1 = vcmask 1040384   ;;  %v860_v1 = vmov 0  }
  0x3d   :  { %611 = vmatprep.subr.bf16.mxu0 %v858_v0  ;;  %615 = vmatprep.mubr.msk.bf16.mxu0 %vm859_vm0, %v858_v0  ;;  %v134_v2 = vsel %vm132_vm1, 65535, %v860_v1  ;;  %v692_v3 = vld [vmem:[#allocation5 + $0x8] ss:$0 sps:$4 sm:$0x11]   ;;  %v693_v6 = vld [vmem:[#allocation5] sm:$0xff]   ;;  %v694_v8 = vld [vmem:[#allocation2] sm:$0xff]  }
  0x3e   :  { %619 = vmatprep.subr.bf16.mxu1 %v858_v0  ;;  %635 = vmatprep.mubr.msk.bf16.mxu1 %vm859_vm0, %v858_v0  ;;  %v136_v4 = vand.u32 %v692_v3, %v134_v2  ;;  %v695_v5 = vld [vmem:[#allocation7 + $0x38] sm:$0xff]   ;;  %v696_v7 = vld [vmem:[#allocation7 + $0x30] sm:$0xff]   ;;  %vm128_vm2 = vcmask 138240   ;;  %v697_v9 = vld [vmem:[#allocation7 + $0x28] sm:$0xff]  }
  0x3f   :  { %620 = vmatpush3.bf16.msra.mxu1 %v695_v5  ;;  %v698_v10 = vld [vmem:[#allocation7 + $0x20] sm:$0xff]   ;;  %v699_v11 = vld [vmem:[#allocation7 + $0x18] sm:$0xff]   ;;  %v700_v12 = vld [vmem:[#allocation7 + $0x10] sm:$0xff]  }
  0x40   :  { %612 = vmatpush3.bf16.msra.mxu0 %v136_v4  ;;  %621 = vmatprep.subr.bf16.mxu1 %v858_v0  ;;  %v701_v13 = vld [vmem:[#allocation7 + $0x8] sm:$0xff]   ;;  %v702_v14 = vld [vmem:[#allocation7] sm:$0xff]   ;;  %v703_v15 = vld [vmem:[#allocation8 + $0x38] sm:$0xff]  }
  0x41   :  { %613 = vmatprep.subr.bf16.mxu0 %v858_v0  ;;  %v704_v16 = vld [vmem:[#allocation8 + $0x30] sm:$0xff]   ;;  %v705_v17 = vld [vmem:[#allocation8 + $0x28] sm:$0xff]   ;;  %v706_v18 = vld [vmem:[#allocation8 + $0x20] sm:$0xff]  }
  0x42   :  { %v707_v19 = vld [vmem:[#allocation8 + $0x18] sm:$0xff]   ;;  %v549_v20 = vld [vmem:[%s995_s2] ss:$0 sm:$0xff]  ;;  %v708_v30 = vld [vmem:[#allocation8 + $0x10] sm:$0xff]  }
  0x43   :  { %622 = vmatpush3.bf16.msra.mxu1 %v696_v7  ;;  %v709_v31 = vld [vmem:[#allocation8 + $0x8] sm:$0xff]   ;;  %v710_v32 = vld [vmem:[#allocation8] sm:$0xff]   ;;  %v711_v33 = vld [vmem:[#allocation10 + $0x38] sm:$0xff]  }
  0x44   :  { %614 = vmatpush3.bf16.msra.mxu0 %v693_v6  ;;  %623 = vmatprep.subr.bf16.mxu1 %v858_v0  ;;  %v712_v34 = vld [vmem:[#allocation10 + $0x30] sm:$0xff]   ;;  %v713_v35 = vld [vmem:[#allocation10 + $0x28] sm:$0xff]   ;;  %v714_v36 = vld [vmem:[#allocation10 + $0x20] sm:$0xff]  }
  0x45   :  { %639 = vmatprep.subr.bf16.mxu0 %v858_v0  ;;  %v715_v37 = vld [vmem:[#allocation10 + $0x18] sm:$0xff]   ;;  %v554_v38 = vld [vmem:[%s997_s4] ss:$0 sm:$0xff]  ;;  %v716_v48 = vld [vmem:[#allocation10 + $0x10] sm:$0xff]  }
  0x46   :  { %v717_v49 = vld [vmem:[#allocation10 + $0x8] sm:$0xff]   ;;  %v718_v50 = vld [vmem:[#allocation10] sm:$0xff]  }
  0x47   :  { %616 = vmatmul.mubr.msk.bf16.vlgmr.msra.gmra.mxu0 %vm128_vm2, %v694_v8  ;;  %624 = vmatpush3.bf16.msra.mxu1 %v697_v9  ;;  %v563_v51 = vld [vmem:[%s999_s6] ss:$0 sm:$0xff]  ;;  %s861_s6 = smov [#allocation11]  }
  0x48   :  { %655 = vmatprep.mubr.msk.bf16.mxu0 %vm859_vm0, %v858_v0  ;;  %625 = vmatprep.subr.bf16.mxu1 %v858_v0  ;;  %v572_v61 = vld [vmem:[%s1001_s8] ss:$0 sm:$0xff]  ;;  %s535_s16 = sshll.u32 %s861_s6, 4  ;;  %s536_s16 = int_to_ptr.vmem [resolvable:$true] %s535_s16 }
  0x49   :  { %640 = vmatpush3.bf16.msra.mxu0 %v703_v15  ;;  %s823_s17 = scalar_lea.vmem %s536_s16, 256  ;;  %p828_p12 = scmp.lt.s32.totalorder %s536_s16, %s536_s16 }
  0x4a   :  { %641 = vmatprep.subr.bf16.mxu0 %v858_v0  ;;  %p824_p11 = scmp.ne.s32.totalorder %s536_s16, %s823_s17  ;;  %p829_p13 = scmp.lt.s32.totalorder %s823_s17, %s823_s17 }
  0x4b   :  { %626 = vmatpush3.bf16.msra.mxu1 %v698_v10 }
  0x4c   :  { %627 = vmatprep.subr.bf16.mxu1 %v858_v0  ;;  %p830_p0 = por %p829_p13, %p828_p12 }
  0x4d   :  { %642 = vmatpush3.bf16.msra.mxu0 %v704_v16 }
  0x4e   :  { %643 = vmatprep.subr.bf16.mxu0 %v858_v0  ;;  %p831_p1 = pnand %p830_p0, %p824_p11 }
  0x4f   :  { %628 = vmatpush3.bf16.msra.mxu1 %v699_v11 }
  0x50   :  { %629 = vmatprep.subr.bf16.mxu1 %v858_v0 }
  0x51   :  { %644 = vmatpush3.bf16.msra.mxu0 %v705_v17 }
  0x52   :  { %645 = vmatprep.subr.bf16.mxu0 %v858_v0 }
  0x53   :  { %630 = vmatpush3.bf16.msra.mxu1 %v700_v12 }
  0x54   :  { %631 = vmatprep.subr.bf16.mxu1 %v858_v0 }
  0x55   :  { %646 = vmatpush3.bf16.msra.mxu0 %v706_v18 }
  0x56   :  { %647 = vmatprep.subr.bf16.mxu0 %v858_v0 }
  0x57   :  { %632 = vmatpush3.bf16.msra.mxu1 %v701_v13 }
  0x58   :  { %633 = vmatprep.subr.bf16.mxu1 %v858_v0 }
  0x59   :  { %648 = vmatpush3.bf16.msra.mxu0 %v707_v19 }
  0x5a   :  { %649 = vmatprep.subr.bf16.mxu0 %v858_v0 }
  0x5b   :  { %634 = vmatpush3.bf16.msra.mxu1 %v702_v14 }
  0x5c   :  { %659 = vmatprep.subr.bf16.mxu1 %v858_v0 }
  0x5d   :  { %650 = vmatpush3.bf16.msra.mxu0 %v708_v30 }
  0x5e   :  { %651 = vmatprep.subr.bf16.mxu0 %v858_v0 }
  0x61   :  { %652 = vmatpush3.bf16.msra.mxu0 %v709_v31 }
  0x62   :  { %653 = vmatprep.subr.bf16.mxu0 %v858_v0 }
  0x65   :  { %654 = vmatpush3.bf16.msra.mxu0 %v710_v32 }
 0x107   :  { %v172_v21 = vpop.f32.mrf.mxu0 }
 0x108   :  { %v173_v23 = vadd.f32 %v549_v20, %v172_v21 }
 0x109   :  { %v617_v22 = vpop.f32.mrf.mxu0 }
 0x10a   :  { %v179_v27 = vmax.f32 %v173_v23, 0.0 }
 0x10b   :  { %v175_v24 = vpop.f32.mrf.mxu0 }
 0x10c   :  { %v176_v25 = vadd.f32 %v549_v20, %v175_v24 }
 0x10d   :  { %v618_v26 = vpop.f32.mrf.mxu0 }
 0x10e   :  { %v180_v28 = vmax.f32 %v176_v25, 0.0 }
 0x110   :  { %v181_v29 = vpack.c.bf16 %v180_v28, %v179_v27 }
 0x112   :  { %636 = vmatmul.mubr.bf16.vlgmr.msra.gmra.mxu1 %v181_v29 }
 0x113   :  { %675 = vmatprep.mubr.msk.bf16.mxu1 %vm859_vm0, %v858_v0  ;;  %660 = vmatpush3.bf16.msra.mxu1 %v711_v33 }
 0x114   :  { %661 = vmatprep.subr.bf16.mxu1 %v858_v0 }
 0x117   :  { %662 = vmatpush3.bf16.msra.mxu1 %v712_v34 }
 0x118   :  { %663 = vmatprep.subr.bf16.mxu1 %v858_v0 }
 0x11b   :  { %664 = vmatpush3.bf16.msra.mxu1 %v713_v35 }
 0x11c   :  { %665 = vmatprep.subr.bf16.mxu1 %v858_v0 }
 0x11f   :  { %666 = vmatpush3.bf16.msra.mxu1 %v714_v36 }
 0x120   :  { %667 = vmatprep.subr.bf16.mxu1 %v858_v0 }
 0x123   :  { %668 = vmatpush3.bf16.msra.mxu1 %v715_v37 }
 0x124   :  { %669 = vmatprep.subr.bf16.mxu1 %v858_v0 }
 0x127   :  { %670 = vmatpush3.bf16.msra.mxu1 %v716_v48 }
 0x128   :  { %671 = vmatprep.subr.bf16.mxu1 %v858_v0 }
 0x12b   :  { %672 = vmatpush3.bf16.msra.mxu1 %v717_v49 }
 0x12c   :  { %673 = vmatprep.subr.bf16.mxu1 %v858_v0 }
 0x12f   :  { %674 = vmatpush3.bf16.msra.mxu1 %v718_v50 }
 0x1d2   :  { %v287_v39 = vpop.f32.mrf.mxu1 }
 0x1d3   :  { %v288_v41 = vadd.f32 %v554_v38, %v287_v39 }
 0x1d4   :  { %v637_v40 = vpop.f32.mrf.mxu1 }
 0x1d5   :  { %v294_v45 = vmax.f32 %v288_v41, 0.0 }
 0x1d6   :  { %v290_v42 = vpop.f32.mrf.mxu1 }
 0x1d7   :  { %v291_v43 = vadd.f32 %v554_v38, %v290_v42 }
 0x1d8   :  { %v638_v44 = vpop.f32.mrf.mxu1 }
 0x1d9   :  { %v295_v46 = vmax.f32 %v291_v43, 0.0 }
 0x1db   :  { %v296_v47 = vpack.c.bf16 %v295_v46, %v294_v45 }
 0x1dd   :  { %656 = vmatmul.mubr.bf16.vlgmr.msra.gmra.mxu0 %v296_v47 }
 0x29d   :  { %v402_v52 = vpop.f32.mrf.mxu0 }
 0x29e   :  { %v403_v54 = vadd.f32 %v563_v51, %v402_v52 }
 0x29f   :  { %v657_v53 = vpop.f32.mrf.mxu0 }
 0x2a0   :  { %v409_v58 = vmax.f32 %v403_v54, 0.0 }
 0x2a1   :  { %v405_v55 = vpop.f32.mrf.mxu0 }
 0x2a2   :  { %v406_v56 = vadd.f32 %v563_v51, %v405_v55 }
 0x2a3   :  { %v658_v57 = vpop.f32.mrf.mxu0 }
 0x2a4   :  { %v410_v59 = vmax.f32 %v406_v56, 0.0 }
 0x2a6   :  { %v411_v60 = vpack.c.bf16 %v410_v59, %v409_v58 }
 0x2a8   :  { %676 = vmatmul.mubr.bf16.vlgmr.msra.gmra.mxu1 %v411_v60 }
 0x368   :  { %v517_v62 = vpop.f32.mrf.mxu1 }
 0x369   :  { %v518_v63 = vadd.f32 %v572_v61, %v517_v62 }
 0x36a   :  { %v677_v0 = vpop.f32.mrf.mxu1 }
 0x36b   :  { %719 = vtanh.f32 %v518_v63 }
 0x36c   :  { %v520_v1 = vpop.f32.mrf.mxu1 }
 0x36d   :  { %v521_v2 = vadd.f32 %v572_v61, %v520_v1 }
 0x36e   :  { %v678_v3 = vpop.f32.mrf.mxu1 }
 0x36f   :  { %721 = vtanh.f32 %v521_v2 }
 0x378   :  { %v720_v4 = vpop.eup %719 }
 0x379   :  { %v526_v5 = vmul.f32 2.0, %v720_v4 }
 0x37b   :  { %528 = vst [vmem:[#allocation11] sm:$0xff] %v526_v5 }
 0x37c   :  { %v722_v6 = vpop.eup %721 }
 0x37d   :  { %v527_v7 = vmul.f32 2.0, %v722_v6 }
 0x37f   :  { %529 = vst [vmem:[#allocation11 + $0x8] sm:$0xff] %v527_v7 }
 0x380   :  { %834 = shalt.err (!%p831_p1)
}
 0x381   :  { %s862_s8 = smov 128   ;;  %s863_s18 = smov 8  }
 0x382   :  { %541 = dma.vmem_to_hbm [thread:$0]  %s536_s16, 256, %s1002_s9, [#allocation4], %s862_s8, %s862_s8, %s863_s18  }
 0x383   :  { %849 = dma.done.wait [#allocation4], 256  }
 0x384   :  { %850 = vsyncadd [#allocation4], 4294967040 }
 0x385   :  { %545 = vsyncpa [#allocation3], 1 }
 0x386   :  { %546 = vsyncpa [#allocation6], 1 }
 0x387   :  { %547 = vsyncpa [#allocation9], 1 }
 0x388   :  { %548 = vsyncpa [#allocation4], 1 }

</bundles_post_ra>
